<compile_context>
chip_gen: v6e
topology: v6e:2x2x1
jax: 0.10.0
libtpu: 0.0.40
codegen_flags: <defaults>
</compile_context>

<pallas_src>
import functools
import math

import jax
import jax.numpy as jnp
from jax import lax
from jax.experimental import pallas as pl
from jax.experimental.pallas import tpu as pltpu

_TM_MAX = 512   # sublane tile for M (multiple of 8); bigger tm => fewer y re-streams
_TN_MAX = 512   # lane tile for N (multiple of 128, lane-dense stores)


def _round_up(x, m):
    return ((x + m - 1) // m) * m


def _vmem_capacity_bytes():
    try:
        return int(pltpu.get_tpu_info().vmem_capacity_bytes)
    except Exception:
        return 64 << 20          # v7x-safe assumption if the query is unavailable


def _vmem_limit_bytes(footprint, capacity):
    # Enough for the per-step footprint (+ headroom), never above physical VMEM.
    return int(min(capacity - (8 << 20), max(32 << 20, footprint + (8 << 20))))


def _choose_tiles(M, N, H, in_bytes, out_bytes, budget, force_k_tiling=False):
    """Pick (tm, tn, tk). tk is None when H stays untiled (single MXU pass)."""
    force_k_tiling = force_k_tiling and H >= 128
    tm = min(_TM_MAX, _round_up(M, 8))
    tn = min(_TN_MAX, _round_up(N, 128))

    def footprint(tm_, tn_, th_, ktiled):
        f = 2 * (tm_ + tn_) * th_ * in_bytes          # double-buffered x / y tiles
        f += 2 * tn_ * 4 + 2 * tm_ * tn_ * out_bytes  # ssq_y stream + output tile
        if ktiled:
            f += tm_ * tn_ * 4 + tm_ * 4              # f32 acc + ssq_x scratch
        return f

    if not force_k_tiling:
        # Prefer H untiled (no accumulator init/finalize, clean MXU cadence).
        # Shrink tn before tm: a bigger resident x block means y is re-streamed
        # from HBM fewer times (dominant roofline term, esp. on v5e).
        while footprint(tm, tn, H, False) > budget and (tn > 256 or tm > 256):
            if tn > 256:
                tn //= 2
            else:
                tm //= 2
        if footprint(tm, tn, H, False) <= budget or H < 128:
            # H < 128 cannot be K-tiled (lane block must be a multiple of 128
            # or the full dim) -> keep shrinking tm/tn instead.
            while footprint(tm, tn, H, False) > budget and (tm > 8 or tn > 128):
                if tm >= tn:
                    tm = max(8, _round_up(tm // 2, 8))
                else:
                    tn = max(128, (tn // 2) // 128 * 128)
            return tm, tn, None

    # K-tile over H with a float32 accumulator (bounds VMEM for large hidden
    # sizes without shrinking tm/tn below 256 -> required on v7x's 64 MiB).
    tm = min(tm, 256)
    tn = min(tn, 256)
    fixed = 2 * tn * 4 + 2 * tm * tn * out_bytes + tm * tn * 4 + tm * 4
    avail = max(budget - fixed, 0)
    tk = (avail // (2 * (tm + tn) * in_bytes)) // 128 * 128
    tk = int(max(128, min(tk, _round_up(H, 128))))
    if force_k_tiling:
        tk = 128
    return tm, tn, tk


# ---------------------------------------------------------------------------
# All-pairs cosine / temp  (contrastive hot path)
# ---------------------------------------------------------------------------
def _cosine_kernel(x_ref, y_ref, ssqy_ref, o_ref, *, eps_sq_scaled, negate):
    # x_ref: (tm, H), y_ref: (tn, H), ssqy_ref: (1, tn) (already * temp^2)
    x = x_ref[...]
    y = y_ref[...]
    # NT matmul on the MXU: contract trailing dims of both tiles, f32 accum.
    dots = lax.dot_general(x, y, (((1,), (1,)), ((), ())),
                           preferred_element_type=jnp.float32)        # (tm, tn)
    xf = x.astype(jnp.float32)
    ssq_x = jnp.sum(xf * xf, axis=-1, keepdims=True)                  # (tm, 1)
    # max(nx*ny, eps)/... expressed on squared norms -> single EUP rsqrt,
    # exact product-clamp semantics (temp folded into ssq_y / eps in wrapper).
    denom_sq = jnp.maximum(ssq_x * ssqy_ref[...], eps_sq_scaled)      # (tm, tn)
    out = dots * lax.rsqrt(denom_sq)
    if negate:                                                        # temp < 0
        out = -out
    o_ref[...] = out.astype(o_ref.dtype)


def _cosine_ktiled_kernel(x_ref, y_ref, ssqy_ref, o_ref, acc_ref, ssqx_ref, *,
                          eps_sq_scaled, negate):
    # x_ref: (tm, tk), y_ref: (tn, tk), ssqy_ref: (1, tn); K (=H) is the inner
    # "arbitrary" grid axis with f32 accumulators in VMEM scratch.
    k = pl.program_id(2)

    @pl.when(k == 0)
    def _():
        acc_ref[...] = jnp.zeros_like(acc_ref)
        ssqx_ref[...] = jnp.zeros_like(ssqx_ref)

    x = x_ref[...]
    y = y_ref[...]
    acc_ref[...] += lax.dot_general(x, y, (((1,), (1,)), ((), ())),
                                    preferred_element_type=jnp.float32)
    xf = x.astype(jnp.float32)
    ssqx_ref[...] += jnp.sum(xf * xf, axis=-1, keepdims=True)

    @pl.when(k == pl.num_programs(2) - 1)
    def _():
        denom_sq = jnp.maximum(ssqx_ref[...] * ssqy_ref[...], eps_sq_scaled)
        out = acc_ref[...] * lax.rsqrt(denom_sq)
        if negate:
            out = -out
        o_ref[...] = out.astype(o_ref.dtype)


def _pairwise_cosine_over_temp(x2d, y2d, temp, eps=1e-8, *,
                               out_dtype=jnp.float32, matmul_dtype=None,
                               force_k_tiling=False):
    """x2d: (M, H), y2d: (N, H) -> (M, N) cosine-similarity / temp."""
    M, H = x2d.shape
    N, H2 = y2d.shape
    assert H == H2, (x2d.shape, y2d.shape)
    temp = float(temp)
    if temp == 0.0:
        raise ValueError("Similarity temp must be nonzero")
    eps = float(eps)
    at = abs(temp)
    negate = temp < 0.0
    eps_sq_scaled = (eps * at) ** 2

    # Opt-in reduced-precision MXU feed (numerics change, off by default).
    if matmul_dtype is not None:
        x2d = x2d.astype(matmul_dtype)
        y2d = y2d.astype(matmul_dtype)

    in_bytes = x2d.dtype.itemsize
    out_bytes = jnp.dtype(out_dtype).itemsize

    cap = _vmem_capacity_bytes()
    budget = min(int(cap * 0.55), 80 << 20)
    tm, tn, tk = _choose_tiles(M, N, H, in_bytes, out_bytes, budget,
                               force_k_tiling=force_k_tiling)

    M_pad = _round_up(M, tm)
    N_pad = _round_up(N, tn)
    x_p = x2d if M_pad == M else jnp.pad(x2d, ((0, M_pad - M), (0, 0)))
    y_p = y2d if N_pad == N else jnp.pad(y2d, ((0, N_pad - N), (0, 0)))

    # y row squared-norms, f32 accumulation, no materialized f32 copy; temp^2
    # folded in so the /temp is free.  x's squared norms are computed in-kernel
    # from the already-resident x tile (zero extra HBM traffic for x).
    ssq_y = lax.dot_general(y_p, y_p, (((1,), (1,)), ((0,), (0,))),
                            preferred_element_type=jnp.float32)       # (N_pad,)
    ssq_y = (ssq_y * jnp.float32(at * at))[None, :]                   # (1, N_pad)

    cost = pl.CostEstimate(
        flops=int(2.0 * M_pad * N_pad * H),
        transcendentals=int(M_pad * N_pad),
        bytes_accessed=int((M_pad * H + (M_pad // tm) * N_pad * H) * in_bytes
                           + M_pad * N_pad * out_bytes),
    )

    if tk is None:
        grid = (M_pad // tm, N_pad // tn)
        fp = 2 * (tm + tn) * H * in_bytes + 2 * tn * 4 + 2 * tm * tn * out_bytes
        kernel = functools.partial(_cosine_kernel,
                                   eps_sq_scaled=eps_sq_scaled, negate=negate)
        out = pl.pallas_call(
            kernel,
            out_shape=jax.ShapeDtypeStruct((M_pad, N_pad), out_dtype),
            grid_spec=pltpu.PrefetchScalarGridSpec(
                num_scalar_prefetch=0,
                grid=grid,
                in_specs=[
                    pl.BlockSpec((tm, H), lambda i, j: (i, 0)),    # x rows (resident over j)
                    pl.BlockSpec((tn, H), lambda i, j: (j, 0)),    # y rows (NT contraction)
                    pl.BlockSpec((1, tn), lambda i, j: (0, j)),    # ssq_y (lane-dense)
                ],
                out_specs=pl.BlockSpec((tm, tn), lambda i, j: (i, j)),
            ),
            compiler_params=pltpu.CompilerParams(
                dimension_semantics=("parallel", "parallel"),
                vmem_limit_bytes=_vmem_limit_bytes(fp, cap),
            ),
            cost_estimate=cost,
        )(x_p, y_p, ssq_y)
    else:
        H_pad = _round_up(H, tk)
        if H_pad != H:
            x_p = jnp.pad(x_p, ((0, 0), (0, H_pad - H)))
            y_p = jnp.pad(y_p, ((0, 0), (0, H_pad - H)))
        grid = (M_pad // tm, N_pad // tn, H_pad // tk)
        fp = (2 * (tm + tn) * tk * in_bytes + 2 * tn * 4
              + 2 * tm * tn * out_bytes + tm * tn * 4 + tm * 4)
        kernel = functools.partial(_cosine_ktiled_kernel,
                                   eps_sq_scaled=eps_sq_scaled, negate=negate)
        out = pl.pallas_call(
            kernel,
            out_shape=jax.ShapeDtypeStruct((M_pad, N_pad), out_dtype),
            grid_spec=pltpu.PrefetchScalarGridSpec(
                num_scalar_prefetch=0,
                grid=grid,
                in_specs=[
                    pl.BlockSpec((tm, tk), lambda i, j, k: (i, k)),
                    pl.BlockSpec((tn, tk), lambda i, j, k: (j, k)),
                    pl.BlockSpec((1, tn), lambda i, j, k: (0, j)),
                ],
                out_specs=pl.BlockSpec((tm, tn), lambda i, j, k: (i, j)),
                scratch_shapes=[pltpu.VMEM((tm, tn), jnp.float32),
                                pltpu.VMEM((tm, 1), jnp.float32)],
            ),
            compiler_params=pltpu.CompilerParams(
                dimension_semantics=("parallel", "parallel", "arbitrary"),
                vmem_limit_bytes=_vmem_limit_bytes(fp, cap),
            ),
            cost_estimate=cost,
        )(x_p, y_p, ssq_y)

    return out[:M, :N]


# ---------------------------------------------------------------------------
# Row-wise cosine / temp  (generic broadcast fallback, O(R*H))
# ---------------------------------------------------------------------------
def _rowwise_kernel(x_ref, y_ref, o_ref, *, eps_sq, inv_temp, negate):
    x = x_ref[...].astype(jnp.float32)     # (1, H) or (tr, H)
    y = y_ref[...].astype(jnp.float32)     # (1, H) or (tr, H)
    dot = jnp.sum(x * y, axis=-1, keepdims=True)
    ssx = jnp.sum(x * x, axis=-1, keepdims=True)
    ssy = jnp.sum(y * y, axis=-1, keepdims=True)
    out = dot * lax.rsqrt(jnp.maximum(ssx * ssy, eps_sq)) * inv_temp
    if negate:
        out = -out
    o_ref[...] = jnp.broadcast_to(out, o_ref.shape).astype(o_ref.dtype)


def _rowwise_cosine_over_temp(x2d, y2d, R, temp, eps=1e-8):
    """x2d: (1 or R, H), y2d: (1 or R, H) -> (R,) cosine / temp (rows aligned)."""
    H = x2d.shape[-1]
    temp = float(temp)
    if temp == 0.0:
        raise ValueError("Similarity temp must be nonzero")
    negate = temp < 0.0
    inv_temp = 1.0 / abs(temp)
    eps_sq = float(eps) ** 2

    x_bcast = x2d.shape[0] == 1
    y_bcast = y2d.shape[0] == 1
    in_bytes = max(x2d.dtype.itemsize, y2d.dtype.itemsize)

    cap = _vmem_capacity_bytes()
    budget = min(int(cap * 0.55), 80 << 20)
    tr = min(1024, _round_up(R, 8))

    def fp(tr_):
        fx = (1 if x_bcast else tr_) * H * in_bytes
        fy = (1 if y_bcast else tr_) * H * in_bytes
        return 2 * (fx + fy) + 2 * tr_ * 4

    while fp(tr) > budget and tr > 8:
        tr = max(8, _round_up(tr // 2, 8))

    R_pad = _round_up(R, tr)

    def pad_rows(a):
        return a if a.shape[0] == R_pad else jnp.pad(a, ((0, R_pad - a.shape[0]), (0, 0)))

    x_p = x2d if x_bcast else pad_rows(x2d)
    y_p = y2d if y_bcast else pad_rows(y2d)

    x_spec = (pl.BlockSpec((1, H), lambda i: (0, 0)) if x_bcast
              else pl.BlockSpec((tr, H), lambda i: (i, 0)))
    y_spec = (pl.BlockSpec((1, H), lambda i: (0, 0)) if y_bcast
              else pl.BlockSpec((tr, H), lambda i: (i, 0)))

    kernel = functools.partial(_rowwise_kernel, eps_sq=eps_sq,
                               inv_temp=inv_temp, negate=negate)
    out = pl.pallas_call(
        kernel,
        out_shape=jax.ShapeDtypeStruct((R_pad, 1), jnp.float32),
        grid_spec=pltpu.PrefetchScalarGridSpec(
            num_scalar_prefetch=0,
            grid=(R_pad // tr,),
            in_specs=[x_spec, y_spec],
            out_specs=pl.BlockSpec((tr, 1), lambda i: (i, 0)),
        ),
        compiler_params=pltpu.CompilerParams(
            dimension_semantics=("parallel",),
            vmem_limit_bytes=_vmem_limit_bytes(fp(tr), cap),
        ),
    )(x_p, y_p)
    return out[:R, 0]


def _as_rows(a, bshape, H):
    lead = a.shape[:-1]
    if all(d == 1 for d in lead):
        return a.reshape(1, H)                       # broadcast row (no copy)
    if tuple(lead) == tuple(bshape):
        return a.reshape(-1, H)
    # Partial broadcast (rare): materialize only this operand.
    return jnp.broadcast_to(a, tuple(bshape) + (H,)).reshape(-1, H)


# ---------------------------------------------------------------------------
# Module wrapper
# ---------------------------------------------------------------------------
class Similarity:
    """JAX/Pallas port of the PyTorch Similarity module (cosine sim / temp)."""

    def __init__(self, temp, *, matmul_dtype=None, out_dtype=jnp.float32):
        temp = float(temp)
        if temp == 0.0:
            raise ValueError("Similarity temp must be nonzero")
        self.temp = temp
        self.eps = 1e-8                      # nn.CosineSimilarity default
        self.matmul_dtype = matmul_dtype     # opt-in bf16 MXU feed
        self.out_dtype = out_dtype

    def __call__(self, x, y):
        # SimCSE-style contrastive: x (B,1,H), y (1,B',H) -> (B,B')  [MXU path]
        if (x.ndim == 3 and y.ndim == 3 and x.shape[1] == 1 and y.shape[0] == 1
                and x.shape[-1] == y.shape[-1]):
            return _pairwise_cosine_over_temp(
                x[:, 0, :], y[0, :, :], self.temp, self.eps,
                out_dtype=self.out_dtype, matmul_dtype=self.matmul_dtype)

        # Generic broadcast over leading dims, reduction over dim=-1.
        assert x.shape[-1] == y.shape[-1], (x.shape, y.shape)
        H = x.shape[-1]
        bshape = jnp.broadcast_shapes(x.shape[:-1], y.shape[:-1])
        R = int(math.prod(bshape))
        xr = _as_rows(x, bshape, H)
        yr = _as_rows(y, bshape, H)
        out = _rowwise_cosine_over_temp(xr, yr, R, self.temp, self.eps)
        return out.reshape(bshape)


def _reference(x, y, temp, eps=1e-8):
    x = x.astype(jnp.float32)
    y = y.astype(jnp.float32)
    dot = jnp.sum(x * y, axis=-1)
    nx = jnp.sqrt(jnp.sum(x * x, axis=-1))
    ny = jnp.sqrt(jnp.sum(y * y, axis=-1))
    return dot / jnp.maximum(nx * ny, eps) / temp


if __name__ == "__main__":
    key = jax.random.PRNGKey(0)
    kx, ky = jax.random.split(key)

    temp = 0.05
    sim = Similarity(temp)

    # Hot path: (B,1,H) vs (1,B,H) -> (B,B)  [single-shot MXU kernel]
    B, H = 8, 32
    x = jax.random.normal(kx, (B, 1, H), dtype=jnp.float32)
    y = jax.random.normal(ky, (1, B, H), dtype=jnp.float32)
    out = jax.block_until_ready(sim(x, y))
    ref = _reference(x, y, temp)
    assert out.shape == (B, B), out.shape
    # Tolerance covers MXU reduced-precision f32 passes; no approx reciprocal.
    assert jnp.allclose(out, ref, atol=2e-2, rtol=1e-2), \
        float(jnp.max(jnp.abs(out - ref)))

    # K-tiled (H) path, forced, to exercise the accumulator variant.
    B2, H2 = 16, 256
    x2 = jax.random.normal(kx, (B2, H2), dtype=jnp.float32)
    y2 = jax.random.normal(ky, (B2, H2), dtype=jnp.float32)
    out_k = jax.block_until_ready(
        _pairwise_cosine_over_temp(x2, y2, temp, force_k_tiling=True))
    ref_k = _reference(x2[:, None, :], y2[None, :, :], temp)
    assert out_k.shape == (B2, B2), out_k.shape
    assert jnp.allclose(out_k, ref_k, atol=2e-2, rtol=1e-2), \
        float(jnp.max(jnp.abs(out_k - ref_k)))

    # Generic path, element-aligned rows: (2,B,H) vs (2,B,H) -> (2,B)
    xg = jax.random.normal(kx, (2, B, H), dtype=jnp.float32)
    yg = jax.random.normal(ky, (2, B, H), dtype=jnp.float32)
    outg = jax.block_until_ready(sim(xg, yg))
    refg = _reference(xg, yg, temp)
    assert outg.shape == (2, B), outg.shape
    assert jnp.allclose(outg, refg, atol=1e-3, rtol=1e-3), \
        float(jnp.max(jnp.abs(outg - refg)))

    # Generic path with a fully-broadcast operand: (1,1,H) vs (4,B,H) -> (4,B)
    xb = jax.random.normal(kx, (1, 1, H), dtype=jnp.float32)
    yb = jax.random.normal(ky, (4, B, H), dtype=jnp.float32)
    outb = jax.block_until_ready(sim(xb, yb))
    refb = _reference(xb, yb, temp)
    assert outb.shape == (4, B), outb.shape
    assert jnp.allclose(outb, refb, atol=1e-3, rtol=1e-3), \
        float(jnp.max(jnp.abs(outb - refb)))

    print("KERNEL_OK")
</pallas_src>

<mosaic_0001>
module attributes {stable_mosaic.version = 11 : i64} {
  func.func @_cosine_kernel(%arg0: i32, %arg1: i32, %arg2: memref<8x32xf32, #tpu.memory_space<vmem>>, %arg3: memref<128x32xf32, #tpu.memory_space<vmem>>, %arg4: memref<1x128xf32, #tpu.memory_space<vmem>>, %arg5: memref<8x128xf32, #tpu.memory_space<vmem>>) attributes {dimension_semantics = [#tpu.dimension_semantics<parallel>, #tpu.dimension_semantics<parallel>], iteration_bounds = array<i64: 1, 1>, scalar_prefetch = 0 : i64, scratch_operands = 0 : i64, tpu.core_type = #tpu.core_type<tc>, window_params = [{transform_indices = @transform_0, window_bounds = array<i64: 8, 32>}, {transform_indices = @transform_1, window_bounds = array<i64: 128, 32>}, {transform_indices = @transform_2, window_bounds = array<i64: 1, 128>}, {transform_indices = @transform_3, window_bounds = array<i64: 8, 128>}]} {
    %c0 = arith.constant 0 : index
    %c0_0 = arith.constant 0 : index
    %0 = vector.load %arg2[%c0, %c0_0] : memref<8x32xf32, #tpu.memory_space<vmem>>, vector<8x32xf32>
    %c0_1 = arith.constant 0 : index
    %c0_2 = arith.constant 0 : index
    %1 = vector.load %arg3[%c0_1, %c0_2] : memref<128x32xf32, #tpu.memory_space<vmem>>, vector<128x32xf32>
    %cst = arith.constant dense<0.000000e+00> : vector<8x128xf32>
    %2 = tpu.matmul %0, %1, %cst {dimension_numbers = #tpu.dot_dimension_numbers<[1], [1], [0], [0], [0, 0, 1, 0], [], []>} : vector<8x32xf32>, vector<128x32xf32>, vector<8x128xf32> -> vector<8x128xf32>
    %3 = arith.mulf %0, %0 : vector<8x32xf32>
    %cst_3 = arith.constant dense<0.000000e+00> : vector<8xf32>
    %4 = vector.multi_reduction <add>, %3, %cst_3 [1] : vector<8x32xf32> to vector<8xf32>
    %5 = vector.shape_cast %4 : vector<8xf32> to vector<8x1xf32>
    %c0_4 = arith.constant 0 : index
    %c0_5 = arith.constant 0 : index
    %6 = vector.load %arg4[%c0_4, %c0_5] : memref<1x128xf32, #tpu.memory_space<vmem>>, vector<1x128xf32>
    %7 = vector.broadcast %5 : vector<8x1xf32> to vector<8x128xf32>
    %8 = vector.broadcast %6 : vector<1x128xf32> to vector<8x128xf32>
    %9 = arith.mulf %7, %8 : vector<8x128xf32>
    %cst_6 = arith.constant 2.500000e-19 : f32
    %10 = vector.broadcast %cst_6 : f32 to vector<8x128xf32>
    %11 = arith.maximumf %9, %10 : vector<8x128xf32>
    %12 = math.rsqrt %11 : vector<8x128xf32>
    %13 = arith.mulf %2, %12 : vector<8x128xf32>
    %c0_7 = arith.constant 0 : index
    %c0_8 = arith.constant 0 : index
    %14 = vector.load %arg5[%c0_7, %c0_8] : memref<8x128xf32, #tpu.memory_space<vmem>>, vector<8x128xf32>
    tpu.vector_store %arg5[%c0_7, %c0_8], %13 {strides = array<i32>} : memref<8x128xf32, #tpu.memory_space<vmem>>, vector<8x128xf32>,
    return
  }
  func.func @transform_0(%arg0: i32, %arg1: i32) -> (i32, i32) {
    %c0_i32 = arith.constant 0 : i32
    %c0_i32_0 = arith.constant 0 : i32
    return %arg0, %c0_i32 : i32, i32
  }
  func.func @transform_1(%arg0: i32, %arg1: i32) -> (i32, i32) {
    %c0_i32 = arith.constant 0 : i32
    %c0_i32_0 = arith.constant 0 : i32
    return %arg1, %c0_i32 : i32, i32
  }
  func.func @transform_2(%arg0: i32, %arg1: i32) -> (i32, i32) {
    %c0_i32 = arith.constant 0 : i32
    %c0_i32_0 = arith.constant 0 : i32
    return %c0_i32, %arg1 : i32, i32
  }
  func.func @transform_3(%arg0: i32, %arg1: i32) -> (i32, i32) {
    %c0_i32 = arith.constant 0 : i32
    return %arg0, %arg1 : i32, i32
  }
}

</mosaic_0001>

<bundles_post_ra>
// kernel: tpu_custom_call.1
= control target key start
LH: loop header
LB: loop body
LE: loop exit
PB: predicated region body
PF: predicated region fallthrough
CT: control target
= control target key end

     0   :  { %vm32_vm0 = vcmask 261120   ;;  %v281_v1 = vmov 0.0   ;;  %vm282_vm1 = vmmov 0   ;;  %s379_s0 = inlined_call_operand.vmem [shape: f32[8,32], index: 0, kind: input, shape index: {}]   ;;  %s380_s1 = inlined_call_operand.vmem [shape: f32[128,32], index: 1, kind: input, shape index: {}]   ;;  %s381_s2 = inlined_call_operand.vmem [shape: f32[1,128], index: 2, kind: input, shape index: {}]   ;;  %s382_s3 = inlined_call_operand.hbm [shape: f32[8,128], index: 3, kind: output, shape index: {}]  }
   0x1   :  { %v31_v0 = vld [vmem:[%s380_s1 + $0x78] sm:$0xff]  ;;  %219 = vmatprep.subr.mxu0 %v281_v1  ;;  %251 = vmatprep.mubr.msk.f32.mxu0 %vm282_vm1, %v281_v1  ;;  %v30_v2 = vld [vmem:[%s380_s1 + $0x70] sm:$0xff]  ;;  %v15_v3 = vld [vmem:[%s379_s0] sm:$0xff] }
   0x2   :  { %220 = vmatpush3.xpose.msk.msra.mxu0 %vm32_vm0, %v31_v0 }
   0x3   :  { %221 = vmatprep.subr.mxu0 %v281_v1 }
   0x4   :  { %8 = vsyncpa [#allocation3], 0  ;;  %v154_v4 = vmul.f32 %v15_v3, %v15_v3  ;;  %v29_v5 = vld [vmem:[%s380_s1 + $0x68] sm:$0xff]  ;;  %v28_v7 = vld [vmem:[%s380_s1 + $0x60] sm:$0xff]  ;;  %s283_s20 = smov [#allocation2]  }
   0x5   :  { %v27_v8 = vld [vmem:[%s380_s1 + $0x58] sm:$0xff]  ;;  %v26_v9 = vld [vmem:[%s380_s1 + $0x50] sm:$0xff]  ;;  %v25_v10 = vld [vmem:[%s380_s1 + $0x48] sm:$0xff]  ;;  %s176_s21 = sshll.u32 %s283_s20, 4  ;;  %s177_s21 = int_to_ptr.vmem [resolvable:$true] %s176_s21 }
   0x6   :  { %222 = vmatpush3.xpose.msk.msra.mxu0 %vm32_vm0, %v30_v2  ;;  %v155_v6 = vsel %vm32_vm0, %v154_v4, 0.0  ;;  %v24_v11 = vld [vmem:[%s380_s1 + $0x40] sm:$0xff]  ;;  %v23_v12 = vld [vmem:[%s380_s1 + $0x38] sm:$0xff]  ;;  %v22_v13 = vld [vmem:[%s380_s1 + $0x30] sm:$0xff]  ;;  %p264_p1 = scmp.lt.s32.totalorder %s177_s21, %s177_s21 }
   0x7   :  { %223 = vmatprep.subr.mxu0 %v281_v1  ;;  %156 = vadd.xlane.f32.xlu0 %v155_v6  ;;  %v21_v14 = vld [vmem:[%s380_s1 + $0x28] sm:$0xff]  ;;  %v20_v15 = vld [vmem:[%s380_s1 + $0x20] sm:$0xff]  ;;  %v19_v16 = vld [vmem:[%s380_s1 + $0x18] sm:$0xff] }
   0x8   :  { %v18_v17 = vld [vmem:[%s380_s1 + $0x10] sm:$0xff]  ;;  %v17_v18 = vld [vmem:[%s380_s1 + $0x8] sm:$0xff]  ;;  %v16_v19 = vld [vmem:[%s380_s1] sm:$0xff]  ;;  %s259_s1 = scalar_lea.vmem %s177_s21, 128 }
   0x9   :  { %v201_v21 = vld [vmem:[%s381_s2] ss:$0 sm:$0xff]  ;;  %p260_p0 = scmp.ne.s32.totalorder %s177_s21, %s259_s1  ;;  %p265_p2 = scmp.lt.s32.totalorder %s259_s1, %s259_s1 }
   0xa   :  { %224 = vmatpush3.xpose.msk.msra.mxu0 %vm32_vm0, %v29_v5 }
   0xb   :  { %225 = vmatprep.subr.mxu0 %v281_v1  ;;  %p266_p3 = por %p265_p2, %p264_p1 }
   0xd   :  { %p267_p4 = pnand %p266_p3, %p260_p0 }
   0xe   :  { %226 = vmatpush3.xpose.msk.msra.mxu0 %vm32_vm0, %v28_v7 }
   0xf   :  { %227 = vmatprep.subr.mxu0 %v281_v1 }
  0x12   :  { %228 = vmatpush3.xpose.msk.msra.mxu0 %vm32_vm0, %v27_v8 }
  0x13   :  { %229 = vmatprep.subr.mxu0 %v281_v1 }
  0x16   :  { %230 = vmatpush3.xpose.msk.msra.mxu0 %vm32_vm0, %v26_v9 }
  0x17   :  { %231 = vmatprep.subr.mxu0 %v281_v1 }
  0x1a   :  { %232 = vmatpush3.xpose.msk.msra.mxu0 %vm32_vm0, %v25_v10 }
  0x1b   :  { %233 = vmatprep.subr.mxu0 %v281_v1 }
  0x1e   :  { %234 = vmatpush3.xpose.msk.msra.mxu0 %vm32_vm0, %v24_v11 }
  0x1f   :  { %235 = vmatprep.subr.mxu0 %v281_v1 }
  0x22   :  { %236 = vmatpush3.xpose.msk.msra.mxu0 %vm32_vm0, %v23_v12 }
  0x23   :  { %237 = vmatprep.subr.mxu0 %v281_v1 }
  0x26   :  { %238 = vmatpush3.xpose.msk.msra.mxu0 %vm32_vm0, %v22_v13 }
  0x27   :  { %239 = vmatprep.subr.mxu0 %v281_v1 }
  0x2a   :  { %240 = vmatpush3.xpose.msk.msra.mxu0 %vm32_vm0, %v21_v14 }
  0x2b   :  { %241 = vmatprep.subr.mxu0 %v281_v1 }
  0x2e   :  { %242 = vmatpush3.xpose.msk.msra.mxu0 %vm32_vm0, %v20_v15 }
  0x2f   :  { %243 = vmatprep.subr.mxu0 %v281_v1 }
  0x32   :  { %244 = vmatpush3.xpose.msk.msra.mxu0 %vm32_vm0, %v19_v16 }
  0x33   :  { %245 = vmatprep.subr.mxu0 %v281_v1 }
  0x36   :  { %246 = vmatpush3.xpose.msk.msra.mxu0 %vm32_vm0, %v18_v17 }
  0x37   :  { %247 = vmatprep.subr.mxu0 %v281_v1 }
  0x3a   :  { %248 = vmatpush3.xpose.msk.msra.mxu0 %vm32_vm0, %v17_v18 }
  0x3b   :  { %249 = vmatprep.subr.mxu0 %v281_v1 }
  0x3e   :  { %250 = vmatpush3.xpose.msk.msra.mxu0 %vm32_vm0, %v16_v19 }
  0x41   :  { %252 = vmatmul.mubr.msk.f32.vlgmr.msra.gmra.mxu0 %vm32_vm0, %v15_v3 }
  0x90   :  { %v157_v20 = vpop.xlane.xlu0 %156 }
  0x91   :  { %v165_v22 = vmul.f32 %v201_v21, %v157_v20 }
  0x93   :  { %v166_v23 = vmax.f32 %v165_v22, 2.5e-19 }
  0x95   :  { %257 = vrsqrt.f32 %v166_v23 }
  0xa2   :  { %v258_v24 = vpop.eup %257 }
 0x101   :  { %v150_v25 = vpop.f32.mrf.mxu0 }
 0x102   :  { %v168_v26 = vmul.f32 %v258_v24, %v150_v25 }
 0x103   :  { %v253_v27 = vpop.f32.mrf.mxu0 }
 0x104   :  { %169 = vst [vmem:[#allocation2] sm:$0xff] %v168_v26 }
 0x105   :  { %270 = shalt.err (!%p267_p4)
}
 0x106   :  { %179 = dma.vmem_to_hbm [thread:$0]  %s177_s21, 128, %s382_s3, [#allocation3]  }
 0x107   :  { %279 = dma.done.wait [#allocation3], 128  }
 0x108   :  { %280 = vsyncadd [#allocation3], 4294967168 }
 0x109   :  { %183 = vsyncpa [#allocation3], 1 }

</bundles_post_ra>
